<compile_context>
chip_gen: v5e
topology: v5e:2x2
jax: 0.10.0
libtpu: 0.0.40
codegen_flags: <defaults>
</compile_context>

<pallas_src>
import functools

import jax
import jax.numpy as jnp
from jax import lax
from jax.experimental import pallas as pl
from jax.experimental.pallas import tpu as pltpu


def _residual_stack_kernel(x_ref, w1_ref, w2_ref, o_ref, *, H, W):
    # x_ref : (1, Cp, N)      N = BB*H*W, lane axis dense (multiple of 128)
    # w1_ref: (L, Ch, 9*Cp)   bf16 3x3 conv weights, im2col layout (tap-major K)
    # w2_ref: (L, Cp, Ch)     bf16 1x1 conv weights (channel matmul)
    # o_ref : (1, Cp, N)
    _, Cp, N = x_ref.shape
    L = w1_ref.shape[0]
    HW = H * W

    x = x_ref[0].astype(jnp.float32)                          # (Cp, N)

    # Per-image flat index (the lane axis may hold several folded images).
    f = lax.broadcasted_iota(jnp.int32, (1, N), 1)
    fi = (f & (HW - 1)) if HW & (HW - 1) == 0 else (f % HW)
    col = (fi & (W - 1)) if W & (W - 1) == 0 else (fi % W)
    row_ok = {-1: fi >= W, 0: None, 1: fi < (H - 1) * W}
    col_ok = {-1: col >= 1, 0: None, 1: col <= W - 2}

    # Precompute the 8 combined border masks once (layer independent).
    masks = {}
    for ky in (-1, 0, 1):
        for kx in (-1, 0, 1):
            m = row_ok[ky]
            if col_ok[kx] is not None:
                m = col_ok[kx] if m is None else (m & col_ok[kx])
            masks[(ky, kx)] = m          # None => center tap, no mask needed

    def im2col(a):
        # tap(ky,kx)[c, f] = a[c, f + ky*W + kx], zero outside the image.
        # 3 row-shifted bases (two big rolls), then +-1 lane rolls for columns.
        base = {ky: (pltpu.roll(a, (-ky * W) % N, axis=1) if ky else a)
                for ky in (-1, 0, 1)}
        taps = []
        for ky in (-1, 0, 1):
            for kx in (-1, 0, 1):
                t = pltpu.roll(base[ky], (-kx) % N, axis=1) if kx else base[ky]
                m = masks[(ky, kx)]
                if m is not None:
                    t = jnp.where(m, t, 0.0)
                taps.append(t)
        return jnp.concatenate(taps, axis=0)                  # (9*Cp, N)

    # TODO(synk): for large L switch to lax.fori_loop with dynamic w{1,2}_ref[l]
    # indexing (or an 'arbitrary' grid axis over L) to bound vreg live ranges.
    for l in range(L):                                        # static unroll
        a = jnp.maximum(x, 0.0)                               # first ReLU (f32)
        k_mat = im2col(a).astype(jnp.bfloat16)
        h = jnp.dot(w1_ref[l], k_mat,
                    preferred_element_type=jnp.float32)       # 3x3 conv (Ch, N)
        h = jnp.maximum(h, 0.0).astype(jnp.bfloat16)          # second ReLU
        y = jnp.dot(w2_ref[l], h,
                    preferred_element_type=jnp.float32)       # 1x1 conv (Cp, N)
        x = x + y                                             # residual (f32)

    o_ref[0] = jnp.maximum(x, 0.0).astype(o_ref.dtype)        # final ReLU


def _round_up(a, m):
    return (a + m - 1) // m * m


def _pick_batch_block(B, HW, lane_cap=16384):
    """Fold batch into the lane axis to amortize per-step overhead, but keep
    >= 2 grid programs whenever B >= 2 so both v7x TensorCores get work."""
    best = 1
    for bb in range(1, B + 1):
        if B % bb or bb * HW > lane_cap:
            continue
        if B >= 2 and B // bb < 2:
            continue
        best = bb
    return best


def residual_stack(x_nchw, w1, w2, *, batch_block=None):
    """x_nchw: (B,Cin,H,W); w1: (L,3,3,Cin,Ch) HWIO; w2: (L,Ch,Cin) -> (B,Cin,H,W)."""
    B, Cin, H, W = x_nchw.shape
    L, _, _, _, Ch = w1.shape
    HW = H * W
    Cp = _round_up(Cin, 8)                 # sublane-aligned channel count

    BB = batch_block or _pick_batch_block(B, HW)
    assert B % BB == 0
    nB = B // BB
    N = BB * HW

    # Activations: NCHW -> (nB, Cp, BB*HW). Channel pad + batch fold are tiny
    # one-time layout ops; when BB == 1 the transpose is a no-op.
    x_flat = x_nchw.reshape(B, Cin, HW)
    if Cp != Cin:
        x_flat = jnp.pad(x_flat, ((0, 0), (0, Cp - Cin), (0, 0)))
    x_fold = jnp.transpose(x_flat.reshape(nB, BB, Cp, HW),
                           (0, 2, 1, 3)).reshape(nB, Cp, N)

    # One-time weight re-layouts (outside the kernel), pre-cast to bf16:
    #   (L,3,3,Cin,Ch) -> (L, Ch, 9*Cp)  im2col matmul operand (tap-major K)
    #   (L,Ch,Cin)     -> (L, Cp, Ch)    1x1 channel matmul
    w1p = jnp.pad(w1, ((0, 0), (0, 0), (0, 0), (0, Cp - Cin), (0, 0)))
    w1m = jnp.transpose(w1p.reshape(L, 9 * Cp, Ch), (0, 2, 1)).astype(jnp.bfloat16)
    w2p = jnp.pad(w2, ((0, 0), (0, 0), (0, Cp - Cin)))
    w2m = jnp.transpose(w2p, (0, 2, 1)).astype(jnp.bfloat16)

    kernel = functools.partial(_residual_stack_kernel, H=H, W=W)

    bytes_io = (x_fold.size + nB * Cp * N) * 4 + w1m.size * 2 + w2m.size * 2
    cost = pl.CostEstimate(
        flops=2 * L * B * HW * (9 * Cin * Ch + Ch * Cin),
        transcendentals=0,
        bytes_accessed=bytes_io)

    # TODO(synk): for realistic VQ-VAE sizes (H,W >= 64, C >= 128) add a spatial
    # grid axis with a 1-row halo, size the band per pltpu.get_tpu_info() (v7x
    # has 64 MiB VMEM vs 128 MiB on v5e/v6e) and set vmem_limit_bytes.
    out_fold = pl.pallas_call(
        kernel,
        out_shape=jax.ShapeDtypeStruct((nB, Cp, N), x_nchw.dtype),
        grid_spec=pltpu.PrefetchScalarGridSpec(
            num_scalar_prefetch=0,
            grid=(nB,),
            in_specs=[
                pl.BlockSpec((1, Cp, N), lambda b: (b, 0, 0)),
                pl.BlockSpec((L, Ch, 9 * Cp), lambda b: (0, 0, 0)),
                pl.BlockSpec((L, Cp, Ch), lambda b: (0, 0, 0)),
            ],
            out_specs=pl.BlockSpec((1, Cp, N), lambda b: (b, 0, 0)),
        ),
        compiler_params=pltpu.CompilerParams(
            dimension_semantics=("parallel",)),
        cost_estimate=cost,
    )(x_fold, w1m, w2m)

    out = jnp.transpose(out_fold.reshape(nB, Cp, BB, HW),
                        (0, 2, 1, 3)).reshape(B, Cp, H, W)
    return out[:, :Cin]


def residual_stack_ref(x_nchw, w1, w2):
    """Pure-JAX reference (lax.conv, f32) for validation."""
    L = w1.shape[0]
    Ch = w1.shape[4]
    x = jnp.transpose(x_nchw, (0, 2, 3, 1)).astype(jnp.float32)
    for l in range(L):
        a = jax.nn.relu(x)
        h = lax.conv_general_dilated(
            a, w1[l].astype(jnp.float32), (1, 1), "SAME",
            dimension_numbers=("NHWC", "HWIO", "NHWC"))
        h = jax.nn.relu(h)
        y = lax.conv_general_dilated(
            h, w2[l].reshape(1, 1, Ch, -1).astype(jnp.float32), (1, 1), "SAME",
            dimension_numbers=("NHWC", "HWIO", "NHWC"))
        x = x + y
    x = jax.nn.relu(x)
    return jnp.transpose(x, (0, 3, 1, 2))


if __name__ == "__main__":
    # Small shapes consistent with the module: in_channels == num_hiddens = 4,
    # num_residual_hiddens = 8, num_residual_layers = 2, batch=2, spatial=16.
    B, Cin, H, W = 2, 4, 16, 16
    num_hiddens = Cin
    num_residual_hiddens = 8
    num_residual_layers = 2

    key = jax.random.PRNGKey(0)
    kx, k1, k2 = jax.random.split(key, 3)

    x = jax.random.normal(kx, (B, Cin, H, W), dtype=jnp.float32)
    # Deterministic synthetic weights (PyTorch would be OIHW; stored here as HWIO).
    w1 = 0.1 * jax.random.normal(
        k1, (num_residual_layers, 3, 3, Cin, num_residual_hiddens),
        dtype=jnp.float32)
    w2 = 0.1 * jax.random.normal(
        k2, (num_residual_layers, num_residual_hiddens, num_hiddens),
        dtype=jnp.float32)

    out = residual_stack(x, w1, w2)
    out = jax.block_until_ready(out)

    ref = jax.block_until_ready(residual_stack_ref(x, w1, w2))
    assert out.shape == (B, Cin, H, W)
    # bf16 MXU operands with f32 accumulation -> loosened tolerance.
    assert jnp.allclose(out, ref, atol=2e-2, rtol=2e-2), "mismatch vs reference"

    print("KERNEL_OK")
</pallas_src>

<mosaic_0001>
module attributes {stable_mosaic.version = 11 : i64} {
  func.func @_residual_stack_kernel(%arg0: i32, %arg1: memref<1x8x256xf32, #tpu.memory_space<vmem>>, %arg2: memref<2x8x72xbf16, #tpu.memory_space<vmem>>, %arg3: memref<2x8x8xbf16, #tpu.memory_space<vmem>>, %arg4: memref<1x8x256xf32, #tpu.memory_space<vmem>>) attributes {dimension_semantics = [#tpu.dimension_semantics<parallel>], iteration_bounds = array<i64: 2>, scalar_prefetch = 0 : i64, scratch_operands = 0 : i64, tpu.core_type = #tpu.core_type<tc>, window_params = [{transform_indices = @transform_0, window_bounds = array<i64: 1, 8, 256>}, {pipeline_mode = #tpu.pipeline_mode<synchronous>, transform_indices = @transform_1, window_bounds = array<i64: 2, 8, 72>}, {pipeline_mode = #tpu.pipeline_mode<synchronous>, transform_indices = @transform_2, window_bounds = array<i64: 2, 8, 8>}, {transform_indices = @transform_3, window_bounds = array<i64: 1, 8, 256>}]} {
    %c0 = arith.constant 0 : index
    %c0_0 = arith.constant 0 : index
    %c0_1 = arith.constant 0 : index
    %0 = vector.load %arg1[%c0, %c0_0, %c0_1] : memref<1x8x256xf32, #tpu.memory_space<vmem>>, vector<1x8x256xf32>
    %1 = vector.shape_cast %0 : vector<1x8x256xf32> to vector<8x256xf32>
    %2 = tpu.iota {dimensions = array<i32: 1>} : vector<1x256xi32>
    %c255_i32 = arith.constant 255 : i32
    %3 = vector.broadcast %c255_i32 : i32 to vector<1x256xi32>
    %4 = arith.andi %2, %3 : vector<1x256xi32>
    %c15_i32 = arith.constant 15 : i32
    %5 = vector.broadcast %c15_i32 : i32 to vector<1x256xi32>
    %6 = arith.andi %4, %5 : vector<1x256xi32>
    %c16_i32 = arith.constant 16 : i32
    %7 = vector.broadcast %c16_i32 : i32 to vector<1x256xi32>
    %8 = arith.cmpi sge, %4, %7 : vector<1x256xi32>
    %c240_i32 = arith.constant 240 : i32
    %9 = vector.broadcast %c240_i32 : i32 to vector<1x256xi32>
    %10 = arith.cmpi slt, %4, %9 : vector<1x256xi32>
    %c1_i32 = arith.constant 1 : i32
    %11 = vector.broadcast %c1_i32 : i32 to vector<1x256xi32>
    %12 = arith.cmpi sge, %6, %11 : vector<1x256xi32>
    %c14_i32 = arith.constant 14 : i32
    %13 = vector.broadcast %c14_i32 : i32 to vector<1x256xi32>
    %14 = arith.cmpi sle, %6, %13 : vector<1x256xi32>
    %15 = arith.andi %8, %12 : vector<1x256xi1>
    %16 = arith.andi %8, %14 : vector<1x256xi1>
    %17 = arith.andi %10, %12 : vector<1x256xi1>
    %18 = arith.andi %10, %14 : vector<1x256xi1>
    %cst = arith.constant 0.000000e+00 : f32
    %19 = vector.broadcast %cst : f32 to vector<8x256xf32>
    %20 = arith.maximumf %1, %19 : vector<8x256xf32>
    %c16_i32_2 = arith.constant 16 : i32
    %21 = tpu.dynamic_rotate %20 by %c16_i32_2 dim 1 : vector<8x256xf32>, i32 -> vector<8x256xf32>
    %c240_i32_3 = arith.constant 240 : i32
    %22 = tpu.dynamic_rotate %20 by %c240_i32_3 dim 1 : vector<8x256xf32>, i32 -> vector<8x256xf32>
    %c1_i32_4 = arith.constant 1 : i32
    %23 = tpu.dynamic_rotate %21 by %c1_i32_4 dim 1 : vector<8x256xf32>, i32 -> vector<8x256xf32>
    %cst_5 = arith.constant 0.000000e+00 : f32
    %24 = vector.shape_cast %15 : vector<1x256xi1> to vector<1x256xi1>
    %25 = vector.broadcast %24 : vector<1x256xi1> to vector<8x256xi1>
    %26 = vector.broadcast %cst_5 : f32 to vector<8x256xf32>
    %27 = arith.select %25, %23, %26 : vector<8x256xi1>, vector<8x256xf32>
    %cst_6 = arith.constant 0.000000e+00 : f32
    %28 = vector.shape_cast %8 : vector<1x256xi1> to vector<1x256xi1>
    %29 = vector.broadcast %28 : vector<1x256xi1> to vector<8x256xi1>
    %30 = vector.broadcast %cst_6 : f32 to vector<8x256xf32>
    %31 = arith.select %29, %21, %30 : vector<8x256xi1>, vector<8x256xf32>
    %c255_i32_7 = arith.constant 255 : i32
    %32 = tpu.dynamic_rotate %21 by %c255_i32_7 dim 1 : vector<8x256xf32>, i32 -> vector<8x256xf32>
    %cst_8 = arith.constant 0.000000e+00 : f32
    %33 = vector.shape_cast %16 : vector<1x256xi1> to vector<1x256xi1>
    %34 = vector.broadcast %33 : vector<1x256xi1> to vector<8x256xi1>
    %35 = vector.broadcast %cst_8 : f32 to vector<8x256xf32>
    %36 = arith.select %34, %32, %35 : vector<8x256xi1>, vector<8x256xf32>
    %c1_i32_9 = arith.constant 1 : i32
    %37 = tpu.dynamic_rotate %20 by %c1_i32_9 dim 1 : vector<8x256xf32>, i32 -> vector<8x256xf32>
    %cst_10 = arith.constant 0.000000e+00 : f32
    %38 = vector.shape_cast %12 : vector<1x256xi1> to vector<1x256xi1>
    %39 = vector.broadcast %38 : vector<1x256xi1> to vector<8x256xi1>
    %40 = vector.broadcast %cst_10 : f32 to vector<8x256xf32>
    %41 = arith.select %39, %37, %40 : vector<8x256xi1>, vector<8x256xf32>
    %c255_i32_11 = arith.constant 255 : i32
    %42 = tpu.dynamic_rotate %20 by %c255_i32_11 dim 1 : vector<8x256xf32>, i32 -> vector<8x256xf32>
    %cst_12 = arith.constant 0.000000e+00 : f32
    %43 = vector.shape_cast %14 : vector<1x256xi1> to vector<1x256xi1>
    %44 = vector.broadcast %43 : vector<1x256xi1> to vector<8x256xi1>
    %45 = vector.broadcast %cst_12 : f32 to vector<8x256xf32>
    %46 = arith.select %44, %42, %45 : vector<8x256xi1>, vector<8x256xf32>
    %c1_i32_13 = arith.constant 1 : i32
    %47 = tpu.dynamic_rotate %22 by %c1_i32_13 dim 1 : vector<8x256xf32>, i32 -> vector<8x256xf32>
    %cst_14 = arith.constant 0.000000e+00 : f32
    %48 = vector.shape_cast %17 : vector<1x256xi1> to vector<1x256xi1>
    %49 = vector.broadcast %48 : vector<1x256xi1> to vector<8x256xi1>
    %50 = vector.broadcast %cst_14 : f32 to vector<8x256xf32>
    %51 = arith.select %49, %47, %50 : vector<8x256xi1>, vector<8x256xf32>
    %cst_15 = arith.constant 0.000000e+00 : f32
    %52 = vector.shape_cast %10 : vector<1x256xi1> to vector<1x256xi1>
    %53 = vector.broadcast %52 : vector<1x256xi1> to vector<8x256xi1>
    %54 = vector.broadcast %cst_15 : f32 to vector<8x256xf32>
    %55 = arith.select %53, %22, %54 : vector<8x256xi1>, vector<8x256xf32>
    %c255_i32_16 = arith.constant 255 : i32
    %56 = tpu.dynamic_rotate %22 by %c255_i32_16 dim 1 : vector<8x256xf32>, i32 -> vector<8x256xf32>
    %cst_17 = arith.constant 0.000000e+00 : f32
    %57 = vector.shape_cast %18 : vector<1x256xi1> to vector<1x256xi1>
    %58 = vector.broadcast %57 : vector<1x256xi1> to vector<8x256xi1>
    %59 = vector.broadcast %cst_17 : f32 to vector<8x256xf32>
    %60 = arith.select %58, %56, %59 : vector<8x256xi1>, vector<8x256xf32>
    %61 = tpu.concatenate %27, %31, %36, %41, %20, %46, %51, %55, %60 in 0 : vector<8x256xf32>, vector<8x256xf32>, vector<8x256xf32>, vector<8x256xf32>, vector<8x256xf32>, vector<8x256xf32>, vector<8x256xf32>, vector<8x256xf32>, vector<8x256xf32> -> vector<72x256xf32>
    %62 = arith.truncf %61 : vector<72x256xf32> to vector<72x256xbf16>
    %c0_18 = arith.constant 0 : index
    %c0_19 = arith.constant 0 : index
    %c0_20 = arith.constant 0 : index
    %63 = vector.load %arg2[%c0_18, %c0_19, %c0_20] : memref<2x8x72xbf16, #tpu.memory_space<vmem>>, vector<1x8x72xbf16>
    %64 = vector.shape_cast %63 : vector<1x8x72xbf16> to vector<8x72xbf16>
    %cst_21 = arith.constant dense<0.000000e+00> : vector<8x256xf32>
    %65 = tpu.matmul %64, %62, %cst_21 {dimension_numbers = #tpu.dot_dimension_numbers<[1], [0], [0], [1], [0, 0, 1, 1], [], []>} : vector<8x72xbf16>, vector<72x256xbf16>, vector<8x256xf32> -> vector<8x256xf32>
    %cst_22 = arith.constant 0.000000e+00 : f32
    %66 = vector.broadcast %cst_22 : f32 to vector<8x256xf32>
    %67 = arith.maximumf %65, %66 : vector<8x256xf32>
    %68 = arith.truncf %67 : vector<8x256xf32> to vector<8x256xbf16>
    %c0_23 = arith.constant 0 : index
    %c0_24 = arith.constant 0 : index
    %c0_25 = arith.constant 0 : index
    %69 = vector.load %arg3[%c0_23, %c0_24, %c0_25] : memref<2x8x8xbf16, #tpu.memory_space<vmem>>, vector<1x8x8xbf16>
    %70 = vector.shape_cast %69 : vector<1x8x8xbf16> to vector<8x8xbf16>
    %cst_26 = arith.constant dense<0.000000e+00> : vector<8x256xf32>
    %71 = tpu.matmul %70, %68, %cst_26 {dimension_numbers = #tpu.dot_dimension_numbers<[1], [0], [0], [1], [0, 0, 1, 1], [], []>} : vector<8x8xbf16>, vector<8x256xbf16>, vector<8x256xf32> -> vector<8x256xf32>
    %72 = arith.addf %1, %71 : vector<8x256xf32>
    %cst_27 = arith.constant 0.000000e+00 : f32
    %73 = vector.broadcast %cst_27 : f32 to vector<8x256xf32>
    %74 = arith.maximumf %72, %73 : vector<8x256xf32>
    %c16_i32_28 = arith.constant 16 : i32
    %75 = tpu.dynamic_rotate %74 by %c16_i32_28 dim 1 : vector<8x256xf32>, i32 -> vector<8x256xf32>
    %c240_i32_29 = arith.constant 240 : i32
    %76 = tpu.dynamic_rotate %74 by %c240_i32_29 dim 1 : vector<8x256xf32>, i32 -> vector<8x256xf32>
    %c1_i32_30 = arith.constant 1 : i32
    %77 = tpu.dynamic_rotate %75 by %c1_i32_30 dim 1 : vector<8x256xf32>, i32 -> vector<8x256xf32>
    %cst_31 = arith.constant 0.000000e+00 : f32
    %78 = vector.shape_cast %15 : vector<1x256xi1> to vector<1x256xi1>
    %79 = vector.broadcast %78 : vector<1x256xi1> to vector<8x256xi1>
    %80 = vector.broadcast %cst_31 : f32 to vector<8x256xf32>
    %81 = arith.select %79, %77, %80 : vector<8x256xi1>, vector<8x256xf32>
    %cst_32 = arith.constant 0.000000e+00 : f32
    %82 = vector.shape_cast %8 : vector<1x256xi1> to vector<1x256xi1>
    %83 = vector.broadcast %82 : vector<1x256xi1> to vector<8x256xi1>
    %84 = vector.broadcast %cst_32 : f32 to vector<8x256xf32>
    %85 = arith.select %83, %75, %84 : vector<8x256xi1>, vector<8x256xf32>
    %c255_i32_33 = arith.constant 255 : i32
    %86 = tpu.dynamic_rotate %75 by %c255_i32_33 dim 1 : vector<8x256xf32>, i32 -> vector<8x256xf32>
    %cst_34 = arith.constant 0.000000e+00 : f32
    %87 = vector.shape_cast %16 : vector<1x256xi1> to vector<1x256xi1>
    %88 = vector.broadcast %87 : vector<1x256xi1> to vector<8x256xi1>
    %89 = vector.broadcast %cst_34 : f32 to vector<8x256xf32>
    %90 = arith.select %88, %86, %89 : vector<8x256xi1>, vector<8x256xf32>
    %c1_i32_35 = arith.constant 1 : i32
    %91 = tpu.dynamic_rotate %74 by %c1_i32_35 dim 1 : vector<8x256xf32>, i32 -> vector<8x256xf32>
    %cst_36 = arith.constant 0.000000e+00 : f32
    %92 = vector.shape_cast %12 : vector<1x256xi1> to vector<1x256xi1>
    %93 = vector.broadcast %92 : vector<1x256xi1> to vector<8x256xi1>
    %94 = vector.broadcast %cst_36 : f32 to vector<8x256xf32>
    %95 = arith.select %93, %91, %94 : vector<8x256xi1>, vector<8x256xf32>
    %c255_i32_37 = arith.constant 255 : i32
    %96 = tpu.dynamic_rotate %74 by %c255_i32_37 dim 1 : vector<8x256xf32>, i32 -> vector<8x256xf32>
    %cst_38 = arith.constant 0.000000e+00 : f32
    %97 = vector.shape_cast %14 : vector<1x256xi1> to vector<1x256xi1>
    %98 = vector.broadcast %97 : vector<1x256xi1> to vector<8x256xi1>
    %99 = vector.broadcast %cst_38 : f32 to vector<8x256xf32>
    %100 = arith.select %98, %96, %99 : vector<8x256xi1>, vector<8x256xf32>
    %c1_i32_39 = arith.constant 1 : i32
    %101 = tpu.dynamic_rotate %76 by %c1_i32_39 dim 1 : vector<8x256xf32>, i32 -> vector<8x256xf32>
    %cst_40 = arith.constant 0.000000e+00 : f32
    %102 = vector.shape_cast %17 : vector<1x256xi1> to vector<1x256xi1>
    %103 = vector.broadcast %102 : vector<1x256xi1> to vector<8x256xi1>
    %104 = vector.broadcast %cst_40 : f32 to vector<8x256xf32>
    %105 = arith.select %103, %101, %104 : vector<8x256xi1>, vector<8x256xf32>
    %cst_41 = arith.constant 0.000000e+00 : f32
    %106 = vector.shape_cast %10 : vector<1x256xi1> to vector<1x256xi1>
    %107 = vector.broadcast %106 : vector<1x256xi1> to vector<8x256xi1>
    %108 = vector.broadcast %cst_41 : f32 to vector<8x256xf32>
    %109 = arith.select %107, %76, %108 : vector<8x256xi1>, vector<8x256xf32>
    %c255_i32_42 = arith.constant 255 : i32
    %110 = tpu.dynamic_rotate %76 by %c255_i32_42 dim 1 : vector<8x256xf32>, i32 -> vector<8x256xf32>
    %cst_43 = arith.constant 0.000000e+00 : f32
    %111 = vector.shape_cast %18 : vector<1x256xi1> to vector<1x256xi1>
    %112 = vector.broadcast %111 : vector<1x256xi1> to vector<8x256xi1>
    %113 = vector.broadcast %cst_43 : f32 to vector<8x256xf32>
    %114 = arith.select %112, %110, %113 : vector<8x256xi1>, vector<8x256xf32>
    %115 = tpu.concatenate %81, %85, %90, %95, %74, %100, %105, %109, %114 in 0 : vector<8x256xf32>, vector<8x256xf32>, vector<8x256xf32>, vector<8x256xf32>, vector<8x256xf32>, vector<8x256xf32>, vector<8x256xf32>, vector<8x256xf32>, vector<8x256xf32> -> vector<72x256xf32>
    %116 = arith.truncf %115 : vector<72x256xf32> to vector<72x256xbf16>
    %c1 = arith.constant 1 : index
    %c0_44 = arith.constant 0 : index
    %c0_45 = arith.constant 0 : index
    %117 = vector.load %arg2[%c1, %c0_44, %c0_45] : memref<2x8x72xbf16, #tpu.memory_space<vmem>>, vector<1x8x72xbf16>
    %118 = vector.shape_cast %117 : vector<1x8x72xbf16> to vector<8x72xbf16>
    %cst_46 = arith.constant dense<0.000000e+00> : vector<8x256xf32>
    %119 = tpu.matmul %118, %116, %cst_46 {dimension_numbers = #tpu.dot_dimension_numbers<[1], [0], [0], [1], [0, 0, 1, 1], [], []>} : vector<8x72xbf16>, vector<72x256xbf16>, vector<8x256xf32> -> vector<8x256xf32>
    %cst_47 = arith.constant 0.000000e+00 : f32
    %120 = vector.broadcast %cst_47 : f32 to vector<8x256xf32>
    %121 = arith.maximumf %119, %120 : vector<8x256xf32>
    %122 = arith.truncf %121 : vector<8x256xf32> to vector<8x256xbf16>
    %c1_48 = arith.constant 1 : index
    %c0_49 = arith.constant 0 : index
    %c0_50 = arith.constant 0 : index
    %123 = vector.load %arg3[%c1_48, %c0_49, %c0_50] : memref<2x8x8xbf16, #tpu.memory_space<vmem>>, vector<1x8x8xbf16>
    %124 = vector.shape_cast %123 : vector<1x8x8xbf16> to vector<8x8xbf16>
    %cst_51 = arith.constant dense<0.000000e+00> : vector<8x256xf32>
    %125 = tpu.matmul %124, %122, %cst_51 {dimension_numbers = #tpu.dot_dimension_numbers<[1], [0], [0], [1], [0, 0, 1, 1], [], []>} : vector<8x8xbf16>, vector<8x256xbf16>, vector<8x256xf32> -> vector<8x256xf32>
    %126 = arith.addf %72, %125 : vector<8x256xf32>
    %cst_52 = arith.constant 0.000000e+00 : f32
    %127 = vector.broadcast %cst_52 : f32 to vector<8x256xf32>
    %128 = arith.maximumf %126, %127 : vector<8x256xf32>
    %c0_53 = arith.constant 0 : index
    %c0_54 = arith.constant 0 : index
    %c0_55 = arith.constant 0 : index
    %129 = vector.load %arg4[%c0_53, %c0_54, %c0_55] : memref<1x8x256xf32, #tpu.memory_space<vmem>>, vector<1x8x256xf32>
    %130 = vector.shape_cast %129 : vector<1x8x256xf32> to vector<8x256xf32>
    %131 = vector.shape_cast %128 : vector<8x256xf32> to vector<1x8x256xf32>
    tpu.vector_store %arg4[%c0_53, %c0_54, %c0_55], %131 {strides = array<i32>} : memref<1x8x256xf32, #tpu.memory_space<vmem>>, vector<1x8x256xf32>,
    return
  }
  func.func @transform_0(%arg0: i32) -> (i32, i32, i32) {
    %c0_i32 = arith.constant 0 : i32
    %c0_i32_0 = arith.constant 0 : i32
    %c0_i32_1 = arith.constant 0 : i32
    return %arg0, %c0_i32, %c0_i32_0 : i32, i32, i32
  }
  func.func @transform_1(%arg0: i32) -> (i32, i32, i32) {
    %c0_i32 = arith.constant 0 : i32
    %c0_i32_0 = arith.constant 0 : i32
    %c0_i32_1 = arith.constant 0 : i32
    %c0_i32_2 = arith.constant 0 : i32
    return %c0_i32, %c0_i32_0, %c0_i32_1 : i32, i32, i32
  }
  func.func @transform_2(%arg0: i32) -> (i32, i32, i32) {
    %c0_i32 = arith.constant 0 : i32
    %c0_i32_0 = arith.constant 0 : i32
    %c0_i32_1 = arith.constant 0 : i32
    %c0_i32_2 = arith.constant 0 : i32
    return %c0_i32, %c0_i32_0, %c0_i32_1 : i32, i32, i32
  }
  func.func @transform_3(%arg0: i32) -> (i32, i32, i32) {
    %c0_i32 = arith.constant 0 : i32
    %c0_i32_0 = arith.constant 0 : i32
    %c0_i32_1 = arith.constant 0 : i32
    return %arg0, %c0_i32, %c0_i32_0 : i32, i32, i32
  }
}

</mosaic_0001>

<bundles_post_ra>
// kernel: tpu_custom_call.1
= control target key start
LH: loop header
LB: loop body
LE: loop exit
PB: predicated region body
PF: predicated region fallthrough
CT: control target
= control target key end

     0   :  { %8 = vsyncpa [#allocation3], 0  ;;  %s1567_s0 = inlined_call_operand.hbm [shape: f32[2,8,256], index: 0, kind: input, shape index: {}]   ;;  %s1568_s1 = inlined_call_operand.hbm [shape: bf16[2,8,72], index: 1, kind: input, shape index: {}]   ;;  %s1569_s2 = inlined_call_operand.hbm [shape: bf16[2,8,8], index: 2, kind: input, shape index: {}]   ;;  %s1570_s3 = inlined_call_operand.hbm [shape: f32[2,8,256], index: 3, kind: output, shape index: {}]  }
   0x1   :  { %10 = vsyncpa [#allocation3 + $0x1], 0 }
   0x2   :  { %11 = vsyncpa [#allocation6], 0 }
   0x3   :  { %12 = vsyncpa [#allocation4], 0 }
   0x4   :  { %14 = vsyncpa [#allocation4 + $0x1], 0  ;;  %s1128_s12 = smov 0   ;;  %s1130_s13 = smov 0  }
   0x5   :  { %s1132_s14 = smov 0   ;;  %s1134_s15 = smov 0  }
   0x6 LB: > { %s130_s18 = sshll.u32 %s1568_s1, 4  ;;  %s1152_s19 = sadd.s32 4294967295, %s1097_s15   ;;  %s1097_s15 = sphi %s1134_s15, %s1637_s15   ;;  %s1093_s14 = sphi %s1132_s14, %s1636_s14   ;;  %s1089_s13 = sphi %s1130_s13, %s1635_s13   ;;  %s1085_s12 = sphi %s1128_s12, %s1634_s12   ;;  %s131_s18 = int_to_ptr.hbm [resolvable:$true] %s130_s18 }
   0x7   : > { %p708_p0 = scmp.ge.s32.totalorder %s1097_s15, 1  ;;  %p41_p1 = scmp.eq.s32.totalorder %s1152_s19, 0 }
   0x8   : > { %p119_p2 = scmp.lt.s32.totalorder %s1097_s15, 3  ;;  %s1099_s21 = smov [#allocation5]  }
   0x9   : > { %s132_s22 = sshll.u32 %s1099_s21, 4  ;;  %s144_s25 = sshll.u32 %s1569_s2, 4  ;;  %s133_s22 = int_to_ptr.vmem [resolvable:$true] %s132_s22  ;;  %s145_s25 = int_to_ptr.hbm [resolvable:$true] %s144_s25 }
   0xa   : > { %p1157_p3 = pnand %p708_p0, %p119_p2  ;;  %s1100_s26 = smov [#allocation7]  }
   0xb   : > { %s146_s27 = sshll.u32 %s1100_s26, 4  ;;  %s1101_s28 = smov 64   ;;  %s147_s27 = int_to_ptr.vmem [resolvable:$true] %s146_s27 }
   0xc   : > { %p795_p4 = pneg %p1157_p3  ;;  %s1102_s29 = smov 4  }
   0xd   : > { %s707_s30 = sadd.s32 4294967294, %s1097_s15   ;;  %s1171_s4 = sadd.s32 1, %s1097_s15  }
   0xe   : > { %p796_p6 = pnand %p795_p4, %p41_p1  ;;  %s24_s5 = ssub.s32 %s1097_s15, %s1171_s4 }
   0xf   : > { %s27_s6 = sadd.s32 1, %s1093_s14  ;;  %p25_p7 = scmp.eq.s32.totalorder %s24_s5, 0 }
  0x10   : > { %798 = dma.hbm_to_vmem [thread:$0]  (!%p796_p6), %s131_s18, 128, %s133_s22, [#allocation6], %s1101_s28, %s1101_s28, %s1102_s29  }
  0x11   : > { %801 = dma.hbm_to_vmem [thread:$0]  (!%p796_p6), %s145_s25, 128, %s147_s27, [#allocation6], %s1101_s28, %s1101_s28, %s1102_s29  }
  0x12   : > { %p34_p8 = scmp.ne.s32.totalorder %s1093_s14, %s1089_s13  ;;  %p35_p9 = scmp.eq.s32.totalorder %s1097_s15, 0 }
  0x13   : > { %p40_p10 = scmp.ne.s32.totalorder %s1089_s13, %s1085_s12  ;;  %p106_p13 = scmp.eq.s32.totalorder %s1152_s19, 1 }
  0x14   : > { %s1182_s7 = scalar_select %p25_p7, %s1093_s14, %s27_s6  }
  0x15   : > { %p1184_p11 = por %p35_p9, %p34_p8  ;;  %p1190_p12 = por %p41_p1, %p40_p10 }
  0x16   : > { %p112_p0 = scmp.eq.s32.totalorder %s707_s30, 1  ;;  %p812_p2 = scmp.lt.s32.totalorder %s1097_s15, 2 }
  0x17   : > { %s160_s10 = sand.u32 1, %s1093_s14   ;;  %p1197_p4 = por %p106_p13, %p34_p8 }
  0x18   : > { %p1201_p6 = por %p112_p0, %p40_p10  ;;  %s712_s17 = sshll.u32 %s160_s10, 4 }
  0x19   : > { %s781_s18 = sshll.u32 %s1097_s15, 4  ;;  %s164_s24 = scalar_lea.vmem [#allocation2], %s712_s17 }
  0x1a   : > { %s169_s23 = scalar_lea.hbm %s1567_s0, %s781_s18  ;;  %s173_s25 = sshll.u32 %s164_s24, 4  ;;  %s174_s25 = int_to_ptr.vmem [resolvable:$true] %s173_s25 }
  0x1b   : > { %s171_s26 = sshll.u32 %s169_s23, 4  ;;  %p1211_p7 = pnand %p812_p2, %p1184_p11  ;;  %s172_s26 = int_to_ptr.hbm [resolvable:$true] %s171_s26 }
  0x1c   : > { %s161_s28 = scalar_lea.sflag [#allocation3], %s160_s10  ;;  %s997_s29 = sshra.s32 %s172_s26, 4  ;;  %s998_s29 = int_to_ptr.hbm [resolvable:$true] %s997_s29 }
  0x1d   : > { %s999_s30 = scalar_lea.hbm %s998_s29, 16  ;;  %p1001_p9 = pneg %p1211_p7 }
  0x1e   : > { %p1000_p8 = scmp.ne.s32.totalorder %s998_s29, %s999_s30  ;;  %s1004_s17 = scalar_lea.hbm %s1567_s0, 32 }
  0x1f   : > { %p1005_p11 = scmp.lt.s32.totalorder %s998_s29, %s1567_s0  ;;  %p1006_p0 = scmp.lt.s32.totalorder %s1004_s17, %s999_s30 }
  0x20   : > { %p1002_p10 = pnand %p1001_p9, %p1000_p8 }
  0x21   : > { %p1007_p2 = por %p1006_p0, %p1005_p11 }
  0x22   : > { %p1003_p13 = pneg %p1002_p10 }
  0x24   : > { %p1008_p5 = pnand %p1007_p2, %p1003_p13 }
  0x26   : > { %1011 = shalt.err (!%p1008_p5)
}
  0x27   : > { %805 = dma.hbm_to_vmem [thread:$0]  (!%p1211_p7), %s172_s26, 256, %s174_s25, %s161_s28  }
  0x28   : > { %182 = sbr.rel (%p1157_p3) target bundleno = 1109 (0x455), region = 32  ;;  %s1228_s10 = sand.u32 (!%p1157_p3), 1, %s1089_s13  }
  0x29   : > { %s716_s21 = sshll.u32 (!%p1157_p3), %s1228_s10, 4  ;;  %s185_s22 = scalar_lea.sflag (!%p1157_p3), [#allocation3], %s1228_s10 }
  0x2a   : > { %s188_s23 = scalar_lea.vmem (!%p1157_p3), [#allocation2], %s716_s21 }
  0x2d   : > { %1072 = dma.done.wait (%p1190_p12), %s185_s22, 256  }
  0x2e   : > { %1074 = vsyncadd (%p1190_p12), %s185_s22, 4294967040 }
  0x2f   : > { %1076 = dma.done.wait (%p41_p1), [#allocation6], 256  }
  0x30   : > { %1078 = vsyncadd (%p41_p1), [#allocation6], 4294967040  ;;  %v1242_v0 = vld [vmem:[%s188_s23] sm:$0xff]  ;;  %v1244_v1 = vld [vmem:[%s188_s23 + $0x8] sm:$0xff]  ;;  %s1103_s20 = smov 112   ;;  %s1104_s9 = smov 16   ;;  %v225_v5 = vlaneseq }
  0x31   : > { %v248_v2 = vmax.f32 %v1242_v0, 0.0  ;;  %v249_v3 = vmax.f32 %v1244_v1, 0.0  ;;  %s1105_s24 = smov 1   ;;  %s1106_s25 = smov 127   ;;  %vm1573_vm7 = vcmask 1043456   ;;  %vm1107_vm12 = vmmov 1  }
  0x32   : > { %v1256_v6 = vand.u32 127, %v225_v5  ;;  %s782_s26 = sshll.u32 %s1152_s19, 4  ;;  %s221_s30 = scalar_lea.vmem [#allocation8], %s716_s21 }
  0x33   : > { %v857_v4 = vpack.i.bf16 %v249_v3, %v248_v2  ;;  %s613_s29 = scalar_lea.hbm %s1570_s3, %s782_s26  ;;  %s615_s5 = sshll.u32 %s221_s30, 4  ;;  %s616_s5 = int_to_ptr.vmem [resolvable:$true] %s615_s5 }
  0x34   : > { %vm1572_vm0 = vcmp.lt.s32.totalorder %v1256_v6, 112  ;;  %vm1571_vm1 = vcmp.lt.s32.totalorder %v1256_v6, 16  ;;  %v227_v19 = vadd.s32 128, %v1256_v6  ;;  %v228_v21 = vand.u32 255, %v1256_v6  ;;  %s617_s6 = sshll.u32 %s613_s29, 4  ;;  %s602_s19 = scalar_lea.sflag [#allocation4], %s1228_s10  ;;  %s618_s6 = int_to_ptr.hbm [resolvable:$true] %s617_s6 }
  0x35   : > { %858 = vrot.lane.b32.xlu0 %v857_v4, %s1103_s20  ;;  %878 = vrot.lane.b32.xlu2 %v857_v4, %s1106_s25  ;;  %vm287_vm6 = vcmp.lt.s32.totalorder %v1256_v6, 127  ;;  %vm1576_vm11 = vcmp.lt.s32.totalorder %v1256_v6, 1  ;;  %s1041_s17 = sshra.s32 %s618_s6, 4  ;;  %s1047_s21 = scalar_lea.hbm %s1570_s3, 32  ;;  %s1042_s17 = int_to_ptr.hbm [resolvable:$true] %s1041_s17 }
  0x36   : > { %v229_v20 = vand.u32 255, %v227_v19  ;;  %v1288_v23 = vand.u32 15, %v228_v21  ;;  %vm1341_vm15 = vcmp.ge.s32.totalorder %v228_v21, 16  ;;  %s1043_s18 = scalar_lea.hbm %s1042_s17, 16  ;;  %p1048_p12 = scmp.lt.s32.totalorder %s1042_s17, %s1570_s3 }
  0x37   : > { %p1044_p1 = scmp.ne.s32.totalorder %s1042_s17, %s1043_s18  ;;  %p1049_p7 = scmp.lt.s32.totalorder %s1047_s21, %s1043_s18 }
  0x38   : > { %v1286_v22 = vand.u32 15, %v229_v20  ;;  %vm1290_vm2 = vcmp.lt.s32.totalorder %v229_v20, 240  ;;  %vm1575_vm4 = vcmp.le.s32.totalorder %v1288_v23, 14  ;;  %vm236_vm9 = vcmp.ge.s32.totalorder %v1288_v23, 1  ;;  %v360_v20 = vld [vmem:[#allocation5] sm:$0xf] }
  0x39   : > { %vm1329_vm13 = vmpackc.low %vm1107_vm12, %vm236_vm9  ;;  %p1045_p3 = pnand %p1044_p1, %p1197_p4  ;;  %p1050_p8 = por %p1049_p7, %p1048_p12 }
  0x3a   : > { %vm239_vm3 = vcmp.le.s32.totalorder %v1286_v22, 14  ;;  %vm237_vm8 = vcmp.ge.s32.totalorder %v1286_v22, 1 }
  0x3b   : > { %vm1300_vm5 = vmand %vm1290_vm2, %vm239_vm3  ;;  %p1046_p5 = pneg %p1045_p3 }
  0x3c   : > { %vm1321_vm10 = vmand %vm1290_vm2, %vm237_vm8 }
  0x3d   : > { %863 = vrot.lane.b32.xlu0 %v857_v4, %s1104_s9  ;;  %vm1574_vm14 = vmpackc.low %vm1290_vm2, %vm1321_vm10  ;;  %p1051_p9 = pnand %p1050_p8, %p1046_p5 }
  0x45   : > { %888 = vrot.lane.b32.xlu0 %v857_v4, %s1105_s24 }
  0x8f   : > { %v879_v25 = vpop.permute.xlu2 %878 }
  0x90   : > { %v881_v40 = vunpack.i.h.bf16 %v879_v25  ;;  %v880_v41 = vunpack.i.l.bf16 %v879_v25 }
  0x92   : > { %v312_v56 = vsel %vm287_vm6, %v880_v41, %v881_v40  ;;  %v313_v58 = vsel %vm287_vm6, %v881_v40, %v880_v41 }
  0x93   : > { %v724_v61 = vpack.c.bf16 %v312_v56, %v248_v2  ;;  %v737_v62 = vpack.c.bf16 %v313_v58, %v249_v3 }
  0xa7   : > { %v859_v7 = vpop.permute.xlu0 %858 }
  0xa8   : > { %v861_v8 = vunpack.i.h.bf16 %v859_v7  ;;  %v860_v9 = vunpack.i.l.bf16 %v859_v7 }
  0xaa   : > { %v1261_v10 = vsel %vm1572_vm0, %v860_v9, %v861_v8  ;;  %v1265_v11 = vsel %vm1572_vm0, %v861_v8, %v860_v9  ;;  %vm242_vm0 = vmand %vm1341_vm15, %vm1575_vm4 }
  0xab   : > { %v867_v12 = vpack.i.bf16 %v1265_v11, %v1261_v10 }
  0xad   : > { %868 = vrot.lane.b32.xlu1 %v867_v12, %s1106_s25 }
  0xaf   : > { %v864_v13 = vpop.permute.xlu0 %863 }
  0xb0   : > { %v866_v14 = vunpack.i.h.bf16 %v864_v13  ;;  %v865_v15 = vunpack.i.l.bf16 %v864_v13 }
  0xb2   : > { %v1273_v16 = vsel %vm1571_vm1, %v865_v15, %v866_v14  ;;  %v1277_v17 = vsel %vm1571_vm1, %v866_v14, %v865_v15  ;;  %vm1352_vm1 = vmpackc.low %vm1575_vm4, %vm1107_vm12  ;;  %v1607_v15 = vmov 0 }
  0xb3   : > { %v882_v18 = vpack.i.bf16 %v1273_v16, %v1277_v17 }
  0xb5   : > { %873 = vrot.lane.b32.xlu1 %v867_v12, %s1105_s24  ;;  %883 = vrot.lane.b32.xlu2 %v882_v18, %s1106_s25 }
  0xb7   : > { %v889_v42 = vpop.permute.xlu0 %888 }
  0xb8   : > { %v891_v50 = vunpack.i.h.bf16 %v889_v42  ;;  %v890_v51 = vunpack.i.l.bf16 %v889_v42 }
  0xba   : > { %v301_v63 = vsel %vm1576_vm11, %v891_v50, %v890_v51  ;;  %v300_v4 = vsel %vm1576_vm11, %v890_v51, %v891_v50 }
  0xbd   : > { %893 = vrot.lane.b32.xlu1 %v882_v18, %s1105_s24 }
 0x10f   : > { %v884_v45 = vpop.permute.xlu2 %883 }
 0x110   : > { %v886_v54 = vunpack.i.h.bf16 %v884_v45  ;;  %v885_v55 = vunpack.i.l.bf16 %v884_v45 }
 0x112   : > { %v288_v8 = vsel %vm287_vm6, %v885_v55, %v886_v54  ;;  %v289_v2 = vsel %vm287_vm6, %v886_v54, %v885_v55 }
 0x113   : > { %v740_v12 = vpack.c.bf16 %v300_v4, %v289_v2 }
 0x11f   : > { %v869_v26 = vpop.permute.xlu1 %868 }
 0x120   : > { %v871_v27 = vunpack.i.h.bf16 %v869_v26  ;;  %v870_v28 = vunpack.i.l.bf16 %v869_v26 }
 0x122   : > { %v342_v30 = vsel %vm287_vm6, %v870_v28, %v871_v27  ;;  %v343_v31 = vsel %vm287_vm6, %v871_v27, %v870_v28 }
 0x123   : > { %v348_v32 = vsel %vm1575_vm4, %v342_v30, 0.0  ;;  %v349_v33 = vsel %vm1300_vm5, %v343_v31, 0.0  ;;  %vm1402_vm4 = vmpackc.low %vm237_vm8, %vm239_vm3  ;;  %v402_v30 = vld [vmem:[#allocation7] sm:$0xf] }
 0x124   : > { %v358_v34 = vpack.c.bf16 %v348_v32, %v348_v32  ;;  %v359_v35 = vpack.c.bf16 %v349_v33, %v349_v33 }
 0x126   : > { %v367_v36 = vsel %vm1573_vm7, %v358_v34, 0  ;;  %v370_v37 = vsel %vm1573_vm7, %v359_v35, 0  ;;  %vm1372_vm7 = vmpackc.low %vm239_vm3, %vm1107_vm12 }
 0x127   : > { %v874_v38 = vpop.permute.xlu1 %873  ;;  %375 = vmatpush.bf16.msra.mxu0 %v367_v36  ;;  %388 = vmatpush.bf16.msra.mxu1 %v370_v37 }
 0x128   : > { %v876_v43 = vunpack.i.h.bf16 %v874_v38  ;;  %v875_v44 = vunpack.i.l.bf16 %v874_v38 }
 0x12a   : > { %v325_v47 = vsel %vm1576_vm11, %v876_v43, %v875_v44  ;;  %v324_v48 = vsel %vm1576_vm11, %v875_v44, %v876_v43 }
 0x12b   : > { %v721_v52 = vpack.c.bf16 %v1261_v10, %v325_v47  ;;  %v734_v53 = vpack.c.bf16 %v1265_v11, %v324_v48  ;;  %v727_v11 = vpack.c.bf16 %v301_v63, %v288_v8 }
 0x12d   : > { %722 = vmatpush.bf16.msk.msra.mxu0 %vm1329_vm13, %v721_v52  ;;  %735 = vmatpush.bf16.msk.msra.mxu1 %vm1574_vm14, %v734_v53  ;;  %vm1388_vm14 = vmpackc.low %vm236_vm9, %vm242_vm0 }
 0x12e   : > { %vm1410_vm0 = vmand %vm1341_vm15, %vm236_vm9 }
 0x12f   : > { %v894_v60 = vpop.permute.xlu1 %893  ;;  %vm1577_vm3 = vmpackc.low %vm1341_vm15, %vm1410_vm0 }
 0x130   : > { %v896_v5 = vunpack.i.h.bf16 %v894_v60  ;;  %v895_v7 = vunpack.i.l.bf16 %v894_v60  ;;  %vm1429_vm9 = vmpackc.low %vm1107_vm12, %vm237_vm8  ;;  %vm1609_vm8 = vcmask 1043456  }
 0x131   : > { %725 = vmatpush.bf16.msk.msra.mxu0 %vm1352_vm1, %v724_v61  ;;  %738 = vmatpush.bf16.msk.msra.mxu1 %vm1372_vm7, %v737_v62  ;;  %v1608_v15 = vsel %vm1429_vm9, 4294967295, %v1607_v15  ;;  %vm1610_vm12 = vmmov %vm1609_vm8 }
 0x132   : > { %v270_v13 = vsel %vm1576_vm11, %v896_v5, %v895_v7  ;;  %v269_v14 = vsel %vm1576_vm11, %v895_v7, %v896_v5  ;;  %vm1579_vm11 = vcmask 588800  }
 0x133   : > { %v730_v18 = vpack.c.bf16 %v1277_v17, %v270_v13  ;;  %v743_v19 = vpack.c.bf16 %v1273_v16, %v269_v14 }
 0x135   : > { %728 = vmatpush.bf16.msk.msra.mxu0 %vm1388_vm14, %v727_v11  ;;  %741 = vmatpush.bf16.msk.msra.mxu1 %vm1402_vm4, %v740_v12 }
 0x139   : > { %731 = vmatpush.bf16.msk.msra.mxu0 %vm1577_vm3, %v730_v18  ;;  %744 = vmatpush.bf16.msk.msra.mxu1 %vm1429_vm9, %v743_v19  ;;  %vm1578_vm3 = vcmask 64512  }
 0x13c   : > { %732 = vmatmul.msk.bf16.vlgmr.msra.gmra.mxu0 %vm1579_vm11, %v360_v20  ;;  %745 = vmatmul.msk.bf16.vlgmr.msra.gmra.mxu1 %vm1579_vm11, %v360_v20 }
 0x1b9   : > { %v381_v21 = vpop.f32.mrf.mxu0  ;;  %v394_v22 = vpop.f32.mrf.mxu1 }
 0x1ba   : > { %v398_v17 = vmax.f32 %v381_v21, 0.0  ;;  %v399_v25 = vmax.f32 %v394_v22, 0.0 }
 0x1bc   : > { %v400_v16 = vpack.c.bf16 %v398_v17, %v398_v17  ;;  %v401_v26 = vpack.c.bf16 %v399_v25, %v399_v25 }
 0x1be   : > { %v408_v27 = vsel %vm1609_vm8, %v400_v16, 0  ;;  %v411_v28 = vsel %vm1610_vm12, %v401_v26, 0  ;;  %vm1611_vm8 = vcmp.lt.s32.totalorder %v1256_v6, 112 }
 0x1bf   : > { %420 = vmatpush.bf16.msra.mxu2 %v408_v27  ;;  %433 = vmatpush.bf16.msra.mxu3 %v411_v28  ;;  %vm1612_vm12 = vmmov %vm1611_vm8 }
 0x1c1   : > { %v383_v31 = vpop.f32.mrf.mxu0  ;;  %v396_v32 = vpop.f32.mrf.mxu1 }
 0x1c2   : > { %746 = vmatmul.msk.bf16.vlgmr.msra.gmra.mxu2 %vm1578_vm3, %v402_v30  ;;  %747 = vmatmul.msk.bf16.vlgmr.msra.gmra.mxu3 %vm1578_vm3, %v402_v30  ;;  %vm1613_vm3 = vcmp.lt.s32.totalorder %v1256_v6, 16 }
 0x1c3   : > { %vm1614_vm11 = vmmov %vm1613_vm3 }
 0x245   : > { %v422_v33 = vpop.f32.mrf.mxu2  ;;  %v435_v34 = vpop.f32.mrf.mxu3 }
 0x246   : > { %v1449_v35 = vadd.f32 %v422_v33, %v1242_v0  ;;  %v1452_v36 = vadd.f32 %v435_v34, %v1244_v1 }
 0x248   : > { %v441_v37 = vmax.f32 %v1449_v35, 0.0  ;;  %v442_v38 = vmax.f32 %v1452_v36, 0.0 }
 0x24a   : > { %v902_v40 = vpack.i.bf16 %v442_v38, %v441_v37 }
 0x24c   : > { %903 = vrot.lane.b32.xlu0 %v902_v40, %s1104_s9  ;;  %898 = vrot.lane.b32.xlu2 %v902_v40, %s1103_s20 }
 0x24d   : > { %v424_v41 = vpop.f32.mrf.mxu2  ;;  %v437_v42 = vpop.f32.mrf.mxu3 }
 0x254   : > { %913 = vrot.lane.b32.xlu0 %v902_v40, %s1106_s25 }
 0x2a6   : > { %v899_v43 = vpop.permute.xlu2 %898 }
 0x2a7   : > { %v901_v44 = vunpack.i.h.bf16 %v899_v43  ;;  %v900_v0 = vunpack.i.l.bf16 %v899_v43  ;;  %v518_v43 = vld [vmem:[#allocation5 + $0x4] sm:$0xf] }
 0x2a9   : > { %v453_v1 = vsel %vm1611_vm8, %v900_v0, %v901_v44  ;;  %v454_v45 = vsel %vm1612_vm12, %v901_v44, %v900_v0  ;;  %vm1618_vm12 = vcmp.lt.s32.totalorder %v1256_v6, 1 }
 0x2aa   : > { %v917_v47 = vpack.i.bf16 %v454_v45, %v453_v1  ;;  %vm1619_vm9 = vmmov %vm1618_vm12 }
 0x2ac   : > { %918 = vrot.lane.b32.xlu2 %v917_v47, %s1105_s24  ;;  %908 = vrot.lane.b32.xlu1 %v917_v47, %s1106_s25 }
 0x2b4   : > { %928 = vrot.lane.b32.xlu2 %v902_v40, %s1105_s24 }
 0x2be   : > { %v904_v48 = vpop.permute.xlu0 %903 }
 0x2bf   : > { %v906_v50 = vunpack.i.h.bf16 %v904_v48  ;;  %v905_v51 = vunpack.i.l.bf16 %v904_v48 }
 0x2c1   : > { %v447_v52 = vsel %vm1613_vm3, %v905_v51, %v906_v50  ;;  %v448_v53 = vsel %vm1614_vm11, %v906_v50, %v905_v51  ;;  %vm1615_vm11 = vcmp.le.s32.totalorder %v1288_v23, 14  ;;  %vm1616_vm3 = vcmask 1043456  }
 0x2c2   : > { %v932_v54 = vpack.i.bf16 %v447_v52, %v448_v53  ;;  %vm1617_vm8 = vmmov %vm1616_vm3 }
 0x2c4   : > { %933 = vrot.lane.b32.xlu0 %v932_v54, %s1105_s24  ;;  %923 = vrot.lane.b32.xlu1 %v932_v54, %s1106_s25 }
 0x2c6   : > { %v914_v61 = vpop.permute.xlu0 %913 }
 0x2c7   : > { %v916_v12 = vunpack.i.h.bf16 %v914_v61  ;;  %v915_v13 = vunpack.i.l.bf16 %v914_v61 }
 0x2c9   : > { %v485_v29 = vsel %vm287_vm6, %v915_v13, %v916_v12  ;;  %v486_v22 = vsel %vm287_vm6, %v916_v12, %v915_v13 }
 0x2ca   : > { %v752_v17 = vpack.c.bf16 %v485_v29, %v441_v37  ;;  %v765_v25 = vpack.c.bf16 %v486_v22, %v442_v38 }
 0x306   : > { %v919_v55 = vpop.permute.xlu2 %918 }
 0x307   : > { %v921_v62 = vunpack.i.h.bf16 %v919_v55  ;;  %v920_v63 = vunpack.i.l.bf16 %v919_v55 }
 0x309   : > { %v494_v19 = vsel %vm1618_vm12, %v921_v62, %v920_v63  ;;  %v493_v20 = vsel %vm1619_vm9, %v920_v63, %v921_v62 }
 0x30a   : > { %v749_v23 = vpack.c.bf16 %v453_v1, %v494_v19  ;;  %v762_v21 = vpack.c.bf16 %v454_v45, %v493_v20 }
 0x30e   : > { %v929_v16 = vpop.permute.xlu2 %928 }
 0x30f   : > { %v931_v26 = vunpack.i.h.bf16 %v929_v16  ;;  %v930_v27 = vunpack.i.l.bf16 %v929_v16 }
 0x31e   : > { %v909_v56 = vpop.permute.xlu1 %908 }
 0x31f   : > { %v911_v58 = vunpack.i.h.bf16 %v909_v56  ;;  %v910_v60 = vunpack.i.l.bf16 %v909_v56 }
 0x321   : > { %v503_v4 = vsel %vm287_vm6, %v910_v60, %v911_v58  ;;  %v504_v5 = vsel %vm287_vm6, %v911_v58, %v910_v60 }
 0x322   : > { %v505_v7 = vsel %vm1615_vm11, %v503_v4, 0.0  ;;  %v506_v8 = vsel %vm1300_vm5, %v504_v5, 0.0  ;;  %vm1620_vm5 = vmpackc.low %vm1290_vm2, %vm1321_vm10 }
 0x323   : > { %v515_v2 = vpack.c.bf16 %v505_v7, %v505_v7  ;;  %v516_v11 = vpack.c.bf16 %v506_v8, %v506_v8  ;;  %vm1621_vm2 = vmmov %vm1619_vm9  ;;  %vm1627_vm9 = vcmask 588800  }
 0x324   : > { %v478_v33 = vsel %vm1621_vm2, %v931_v26, %v930_v27  ;;  %vm1628_vm11 = vmmov %vm1627_vm9 }
 0x325   : > { %v523_v14 = vsel %vm1616_vm3, %v515_v2, 0  ;;  %v526_v18 = vsel %vm1617_vm8, %v516_v11, 0 }
 0x326   : > { %531 = vmatpush.bf16.msrb.mxu2 %v523_v14  ;;  %544 = vmatpush.bf16.msrb.mxu3 %v526_v18 }
 0x32a   : > { %750 = vmatpush.bf16.msk.msrb.mxu2 %vm1329_vm13, %v749_v23  ;;  %763 = vmatpush.bf16.msk.msrb.mxu3 %vm1620_vm5, %v762_v21  ;;  %vm1626_vm13 = vnez %v1608_v15  ;;  %v559_v15 = vld [vmem:[#allocation7 + $0x4] sm:$0xf] }
 0x32e   : > { %753 = vmatpush.bf16.msk.msrb.mxu2 %vm1352_vm1, %v752_v17  ;;  %766 = vmatpush.bf16.msk.msrb.mxu3 %vm1372_vm7, %v765_v25  ;;  %vm1622_vm1 = vmmov %vm1621_vm2 }
 0x32f   : > { %v477_v59 = vsel %vm1622_vm1, %v930_v27, %v931_v26  ;;  %vm1623_vm7 = vmmov %vm1622_vm1 }
 0x330   : > { %vm1624_vm10 = vmmov %vm1622_vm1 }
 0x336   : > { %v934_v28 = vpop.permute.xlu0 %933  ;;  %v924_v46 = vpop.permute.xlu1 %923 }
 0x337   : > { %v936_v30 = vunpack.i.h.bf16 %v934_v28  ;;  %v935_v31 = vunpack.i.l.bf16 %v934_v28  ;;  %v926_v24 = vunpack.i.h.bf16 %v924_v46  ;;  %v925_v32 = vunpack.i.l.bf16 %v924_v46 }
 0x339   : > { %v469_v39 = vsel %vm287_vm6, %v925_v32, %v926_v24  ;;  %v470_v57 = vsel %vm287_vm6, %v926_v24, %v925_v32  ;;  %v460_v38 = vsel %vm1623_vm7, %v936_v30, %v935_v31  ;;  %v459_v40 = vsel %vm1624_vm10, %v935_v31, %v936_v30  ;;  %vm1625_vm6 = vmpackc.low %vm1341_vm15, %vm1410_vm0 }
 0x33a   : > { %v755_v34 = vpack.c.bf16 %v478_v33, %v469_v39  ;;  %v768_v37 = vpack.c.bf16 %v477_v59, %v470_v57  ;;  %v758_v41 = vpack.c.bf16 %v448_v53, %v460_v38  ;;  %v771_v42 = vpack.c.bf16 %v447_v52, %v459_v40 }
 0x33b   : > { %vm1631_vm15 = vcmask 64512  }
 0x33c   : > { %756 = vmatpush.bf16.msk.msrb.mxu2 %vm1388_vm14, %v755_v34  ;;  %769 = vmatpush.bf16.msk.msrb.mxu3 %vm1402_vm4, %v768_v37  ;;  %vm1629_vm4 = vmmov %vm1616_vm3 }
 0x33d   : > { %vm1630_vm14 = vmmov %vm1616_vm3 }
 0x33e   : > { %vm1632_vm0 = vmmov %vm1631_vm15 }
 0x340   : > { %759 = vmatpush.bf16.msk.msrb.mxu2 %vm1625_vm6, %v758_v41  ;;  %772 = vmatpush.bf16.msk.msrb.mxu3 %vm1626_vm13, %v771_v42 }
 0x343   : > { %760 = vmatmul.msk.bf16.vlgmr.msrb.gmra.mxu2 %vm1627_vm9, %v518_v43  ;;  %773 = vmatmul.msk.bf16.vlgmr.msrb.gmra.mxu3 %vm1628_vm11, %v518_v43 }
 0x3c6   : > { %v537_v6 = vpop.f32.mrf.mxu2  ;;  %v550_v9 = vpop.f32.mrf.mxu3 }
 0x3c7   : > { %v554_v3 = vmax.f32 %v537_v6, 0.0  ;;  %v555_v44 = vmax.f32 %v550_v9, 0.0 }
 0x3c9   : > { %v556_v0 = vpack.c.bf16 %v554_v3, %v554_v3  ;;  %v557_v1 = vpack.c.bf16 %v555_v44, %v555_v44 }
 0x3cb   : > { %v564_v49 = vsel %vm1629_vm4, %v556_v0, 0  ;;  %v567_v10 = vsel %vm1630_vm14, %v557_v1, 0 }
 0x3cc   : > { %576 = vmatpush.bf16.msrb.mxu0 %v564_v49  ;;  %589 = vmatpush.bf16.msrb.mxu1 %v567_v10 }
 0x3ce   : > { %v539_v45 = vpop.f32.mrf.mxu2  ;;  %v552_v47 = vpop.f32.mrf.mxu3 }
 0x3cf   : > { %774 = vmatmul.msk.bf16.vlgmr.msrb.gmra.mxu0 %vm1631_vm15, %v559_v15  ;;  %775 = vmatmul.msk.bf16.vlgmr.msrb.gmra.mxu1 %vm1632_vm0, %v559_v15 }
 0x44c   : > { %v578_v48 = vpop.f32.mrf.mxu0  ;;  %v591_v50 = vpop.f32.mrf.mxu1 }
 0x44d   : > { %v595_v51 = vadd.f32 %v578_v48, %v1449_v35  ;;  %v596_v52 = vadd.f32 %v591_v50, %v1452_v36 }
 0x44f   : > { %v597_v53 = vmax.f32 %v595_v51, 0.0  ;;  %v598_v54 = vmax.f32 %v596_v52, 0.0 }
 0x451   : > { %599 = vst [vmem:[%s221_s30] sm:$0xff] %v597_v53 }
 0x452   : > { %600 = vst [vmem:[%s221_s30 + $0x8] sm:$0xff] %v598_v54 }
 0x453   : > { %1054 = shalt.err (!%p1051_p9)
}
 0x454   : > { %793 = dma.vmem_to_hbm [thread:$0]  (%p1197_p4), %s616_s5, 256, %s618_s6, %s602_s19   ;;  %v580_v35 = vpop.f32.mrf.mxu0  ;;  %v593_v36 = vpop.f32.mrf.mxu1 }
 0x455 PF: > { %s629_s10 = sand.u32 1, %s1085_s12   ;;  %p1633_p10 = scmp.ge.s32.totalorder %s1097_s15, 2 }
 0x456   : > { %s630_s9 = scalar_lea.sflag [#allocation4], %s629_s10 }
 0x457   : > { %p807_p13 = pnand %p1633_p10, %p1201_p6 }
 0x459   : > { %p808_p11 = pneg %p807_p13 }
 0x45b   : > { %1080 = dma.done.wait (%p808_p11), %s630_s9, 256  }
 0x45c   : > { %1082 = vsyncadd (%p808_p11), %s630_s9, 4294967040  ;;  %p17_p4 = scmp.ge.s32.totalorder %s1171_s4, 4   ;;  %s1634_s12 = smov %s1089_s13 }
 0x45d   : > { %s1635_s13 = smov %s1093_s14  ;;  %s1636_s14 = smov %s1182_s7 }
 0x45e   : > { %s1637_s15 = smov %s1171_s4  ;;  %19 = sbr.rel (!%p17_p4) target bundleno = 6 (0x6), region = 87 }
 0x463   :  { %636 = vsyncpa [#allocation3], 1 }
 0x464   :  { %638 = vsyncpa [#allocation3 + $0x1], 1 }
 0x465   :  { %639 = vsyncpa [#allocation6], 1 }
 0x466   :  { %640 = vsyncpa [#allocation4], 1 }
 0x467   :  { %642 = vsyncpa [#allocation4 + $0x1], 1 }

</bundles_post_ra>
